<compile_context>
chip_gen: v7x
topology: tpu7x:2x2x1
jax: 0.10.0
libtpu: 0.0.40
codegen_flags: <defaults>
</compile_context>

<pallas_src>
import functools

import jax
import jax.numpy as jnp
from jax.experimental import pallas as pl
from jax.experimental.pallas import tpu as pltpu


def _series_decomp_kernel(x_ref, res_ref, mean_ref, *, kernel_size, pad_front):
    """Processes one (L, tC) channel-tile of one batch element.

    mean[i] = (1/k) * sum_{t=0..k-1} x[clip(i + t - pad_front, 0, L-1)]
    res     = x - mean
    """
    x = x_ref[...].astype(jnp.float32)            # (L, tC), kept in-register
    L = x.shape[0]

    row = jax.lax.broadcasted_iota(jnp.int32, x.shape, 0)
    first_row = x[0:1, :]                         # broadcasts over rows
    last_row = x[L - 1:L, :]

    # Tap for shift s = 0 always exists (t = pad_front); start the sum with it.
    acc = x
    for t in range(kernel_size):                  # k is small & static
        s = t - pad_front                         # static Python int
        if s == 0:
            continue
        # rolled[i] = x[(i + s) % L]  — cyclic sublane rotation on the XLU.
        rolled = pltpu.roll(x, shift=(-s) % L, axis=0)
        if s < 0:
            # rows with i + s < 0 must read the replicated first timestep
            tap = jnp.where(row < -s, first_row, rolled)
        else:
            # rows with i + s > L-1 must read the replicated last timestep
            tap = jnp.where(row >= L - s, last_row, rolled)
        acc = acc + tap

    mean = acc * (1.0 / kernel_size)
    mean_ref[...] = mean.astype(mean_ref.dtype)
    res_ref[...] = (x - mean).astype(res_ref.dtype)


def _round_up(n, m):
    return ((n + m - 1) // m) * m


def _vmem_estimate(L, tC, itemsize):
    # 3 pipelined arrays (x, res, mean) double-buffered + ~4 f32-tile temporaries.
    return L * tC * (3 * 2 * itemsize + 4 * 4)


def _pick_channel_tile(C, L, itemsize):
    """Lane-dense channel tile: multiple of 128, sized to a ~24 MiB VMEM budget."""
    c128 = _round_up(C, 128)
    budget = 24 * 1024 * 1024
    for cand in (512, 384, 256, 128):
        if c128 % cand != 0:
            continue
        if _vmem_estimate(L, cand, itemsize) <= budget:
            return cand, c128
    return 128, c128


def series_decomp(x, kernel_size):
    """x: (B, L, C) float array. Returns (res, moving_mean), both (B, L, C)."""
    B, L, C = x.shape
    pad_end = (kernel_size - 1) // 2
    pad_front = kernel_size - 1 - pad_end

    itemsize = jnp.dtype(x.dtype).itemsize
    tC, c_pad = _pick_channel_tile(C, L, itemsize)
    x_in = jnp.pad(x, ((0, 0), (0, 0), (0, c_pad - C))) if c_pad != C else x

    grid = (B, c_pad // tC)
    spec = pl.BlockSpec((pl.Squeezed(), L, tC), lambda b, c: (b, 0, c))

    kernel = functools.partial(
        _series_decomp_kernel, kernel_size=kernel_size, pad_front=pad_front)

    out_shape = (
        jax.ShapeDtypeStruct((B, L, c_pad), x.dtype),   # res
        jax.ShapeDtypeStruct((B, L, c_pad), x.dtype),   # moving_mean
    )

    vmem_limit = int(min(64 * 2**20,
                         max(32 * 2**20, 2 * _vmem_estimate(L, tC, itemsize))))

    res, mean = pl.pallas_call(
        kernel,
        out_shape=out_shape,
        grid_spec=pltpu.PrefetchScalarGridSpec(
            num_scalar_prefetch=0,
            grid=grid,
            in_specs=[spec],
            out_specs=(spec, spec),
        ),
        compiler_params=pltpu.CompilerParams(
            dimension_semantics=("parallel", "parallel"),
            vmem_limit_bytes=vmem_limit,
        ),
    )(x_in)

    if c_pad != C:
        res = res[:, :, :C]
        mean = mean[:, :, :C]
    return res, mean


def _reference(x, kernel_size):
    # Pure-JAX reference mirroring the PyTorch code exactly.
    pad_end = (kernel_size - 1) // 2
    pad_front = kernel_size - 1 - pad_end
    front = jnp.repeat(x[:, 0:1, :], pad_front, axis=1)
    end = jnp.repeat(x[:, -1:, :], pad_end, axis=1)
    xp = jnp.concatenate([front, x, end], axis=1)
    L = x.shape[1]
    mean = jnp.mean(
        jnp.stack([xp[:, j:j + L, :] for j in range(kernel_size)], axis=0), axis=0)
    return x - mean, mean


if __name__ == "__main__":
    key = jax.random.PRNGKey(0)

    # Primary test: shapes consistent with the module (B, L, C), small.
    B, L, C = 2, 16, 32
    kernel_size = 5
    x = jax.random.normal(key, (B, L, C), dtype=jnp.float32)

    res, moving_mean = series_decomp(x, kernel_size)
    res = jax.block_until_ready(res)
    moving_mean = jax.block_until_ready(moving_mean)

    res_ref, mean_ref = _reference(x, kernel_size)
    assert jnp.allclose(res, res_ref, atol=1e-5, rtol=1e-5)
    assert jnp.allclose(moving_mean, mean_ref, atol=1e-5, rtol=1e-5)

    # Secondary test: even kernel_size, non-multiple-of-128 channels, larger shifts.
    B2, L2, C2, k2 = 3, 32, 160, 24
    x2 = jax.random.normal(jax.random.PRNGKey(1), (B2, L2, C2), dtype=jnp.float32)
    res2, mean2 = series_decomp(x2, k2)
    res2 = jax.block_until_ready(res2)
    mean2 = jax.block_until_ready(mean2)
    res2_ref, mean2_ref = _reference(x2, k2)
    assert jnp.allclose(res2, res2_ref, atol=1e-5, rtol=1e-5)
    assert jnp.allclose(mean2, mean2_ref, atol=1e-5, rtol=1e-5)

    print("KERNEL_OK")
</pallas_src>

<mosaic_0001>
module attributes {stable_mosaic.version = 11 : i64} {
  func.func @_series_decomp_kernel(%arg0: i32, %arg1: i32, %arg2: memref<1x16x128xf32, #tpu.memory_space<vmem>>, %arg3: memref<1x16x128xf32, #tpu.memory_space<vmem>>, %arg4: memref<1x16x128xf32, #tpu.memory_space<vmem>>) attributes {dimension_semantics = [#tpu.dimension_semantics<parallel>, #tpu.dimension_semantics<parallel>], iteration_bounds = array<i64: 2, 1>, scalar_prefetch = 0 : i64, scratch_operands = 0 : i64, tpu.core_type = #tpu.core_type<tc>, window_params = [{transform_indices = @transform_0, window_bounds = array<i64: 1, 16, 128>}, {transform_indices = @transform_1, window_bounds = array<i64: 1, 16, 128>}, {transform_indices = @transform_2, window_bounds = array<i64: 1, 16, 128>}]} {
    %c0 = arith.constant 0 : index
    %c0_0 = arith.constant 0 : index
    %c0_1 = arith.constant 0 : index
    %0 = vector.load %arg2[%c0, %c0_0, %c0_1] : memref<1x16x128xf32, #tpu.memory_space<vmem>>, vector<1x16x128xf32>
    %1 = vector.shape_cast %0 : vector<1x16x128xf32> to vector<16x128xf32>
    %2 = tpu.iota {dimensions = array<i32: 0>} : vector<16x128xi32>
    %3 = vector.extract_strided_slice %1 {offsets = [0, 0], sizes = [1, 128], strides = [1, 1]} : vector<16x128xf32> to vector<1x128xf32>
    %4 = vector.extract_strided_slice %1 {offsets = [15, 0], sizes = [1, 128], strides = [1, 1]} : vector<16x128xf32> to vector<1x128xf32>
    %c2_i32 = arith.constant 2 : i32
    %5 = tpu.dynamic_rotate %1 by %c2_i32 dim 0 : vector<16x128xf32>, i32 -> vector<16x128xf32>
    %c2_i32_2 = arith.constant 2 : i32
    %6 = vector.broadcast %c2_i32_2 : i32 to vector<16x128xi32>
    %7 = arith.cmpi slt, %2, %6 : vector<16x128xi32>
    %8 = vector.shape_cast %3 : vector<1x128xf32> to vector<1x128xf32>
    %9 = vector.broadcast %8 : vector<1x128xf32> to vector<16x128xf32>
    %10 = arith.select %7, %9, %5 : vector<16x128xi1>, vector<16x128xf32>
    %11 = arith.addf %1, %10 : vector<16x128xf32>
    %c1_i32 = arith.constant 1 : i32
    %12 = tpu.dynamic_rotate %1 by %c1_i32 dim 0 : vector<16x128xf32>, i32 -> vector<16x128xf32>
    %c1_i32_3 = arith.constant 1 : i32
    %13 = vector.broadcast %c1_i32_3 : i32 to vector<16x128xi32>
    %14 = arith.cmpi slt, %2, %13 : vector<16x128xi32>
    %15 = vector.shape_cast %3 : vector<1x128xf32> to vector<1x128xf32>
    %16 = vector.broadcast %15 : vector<1x128xf32> to vector<16x128xf32>
    %17 = arith.select %14, %16, %12 : vector<16x128xi1>, vector<16x128xf32>
    %18 = arith.addf %11, %17 : vector<16x128xf32>
    %c15_i32 = arith.constant 15 : i32
    %19 = tpu.dynamic_rotate %1 by %c15_i32 dim 0 : vector<16x128xf32>, i32 -> vector<16x128xf32>
    %c15_i32_4 = arith.constant 15 : i32
    %20 = vector.broadcast %c15_i32_4 : i32 to vector<16x128xi32>
    %21 = arith.cmpi sge, %2, %20 : vector<16x128xi32>
    %22 = vector.shape_cast %4 : vector<1x128xf32> to vector<1x128xf32>
    %23 = vector.broadcast %22 : vector<1x128xf32> to vector<16x128xf32>
    %24 = arith.select %21, %23, %19 : vector<16x128xi1>, vector<16x128xf32>
    %25 = arith.addf %18, %24 : vector<16x128xf32>
    %c14_i32 = arith.constant 14 : i32
    %26 = tpu.dynamic_rotate %1 by %c14_i32 dim 0 : vector<16x128xf32>, i32 -> vector<16x128xf32>
    %c14_i32_5 = arith.constant 14 : i32
    %27 = vector.broadcast %c14_i32_5 : i32 to vector<16x128xi32>
    %28 = arith.cmpi sge, %2, %27 : vector<16x128xi32>
    %29 = vector.shape_cast %4 : vector<1x128xf32> to vector<1x128xf32>
    %30 = vector.broadcast %29 : vector<1x128xf32> to vector<16x128xf32>
    %31 = arith.select %28, %30, %26 : vector<16x128xi1>, vector<16x128xf32>
    %32 = arith.addf %25, %31 : vector<16x128xf32>
    %cst = arith.constant 2.000000e-01 : f32
    %33 = vector.broadcast %cst : f32 to vector<16x128xf32>
    %34 = arith.mulf %32, %33 : vector<16x128xf32>
    %c0_6 = arith.constant 0 : index
    %c0_7 = arith.constant 0 : index
    %c0_8 = arith.constant 0 : index
    %35 = vector.load %arg4[%c0_6, %c0_7, %c0_8] : memref<1x16x128xf32, #tpu.memory_space<vmem>>, vector<1x16x128xf32>
    %36 = vector.shape_cast %35 : vector<1x16x128xf32> to vector<16x128xf32>
    %37 = vector.shape_cast %34 : vector<16x128xf32> to vector<1x16x128xf32>
    tpu.vector_store %arg4[%c0_6, %c0_7, %c0_8], %37 {strides = array<i32>} : memref<1x16x128xf32, #tpu.memory_space<vmem>>, vector<1x16x128xf32>,
    %38 = arith.subf %1, %34 : vector<16x128xf32>
    %c0_9 = arith.constant 0 : index
    %c0_10 = arith.constant 0 : index
    %c0_11 = arith.constant 0 : index
    %39 = vector.load %arg3[%c0_9, %c0_10, %c0_11] : memref<1x16x128xf32, #tpu.memory_space<vmem>>, vector<1x16x128xf32>
    %40 = vector.shape_cast %39 : vector<1x16x128xf32> to vector<16x128xf32>
    %41 = vector.shape_cast %38 : vector<16x128xf32> to vector<1x16x128xf32>
    tpu.vector_store %arg3[%c0_9, %c0_10, %c0_11], %41 {strides = array<i32>} : memref<1x16x128xf32, #tpu.memory_space<vmem>>, vector<1x16x128xf32>,
    return
  }
  func.func @transform_0(%arg0: i32, %arg1: i32) -> (i32, i32, i32) {
    %c0_i32 = arith.constant 0 : i32
    %c0_i32_0 = arith.constant 0 : i32
    return %arg0, %c0_i32, %arg1 : i32, i32, i32
  }
  func.func @transform_1(%arg0: i32, %arg1: i32) -> (i32, i32, i32) {
    %c0_i32 = arith.constant 0 : i32
    %c0_i32_0 = arith.constant 0 : i32
    return %arg0, %c0_i32, %arg1 : i32, i32, i32
  }
  func.func @transform_2(%arg0: i32, %arg1: i32) -> (i32, i32, i32) {
    %c0_i32 = arith.constant 0 : i32
    %c0_i32_0 = arith.constant 0 : i32
    return %arg0, %c0_i32, %arg1 : i32, i32, i32
  }
}

</mosaic_0001>

<bundles_post_ra>
// kernel: tpu_custom_call.1
= control target key start
LH: loop header
LB: loop body
LE: loop exit
PB: predicated region body
PF: predicated region fallthrough
CT: control target
= control target key end

     0   :  { %8 = vsyncpa [#allocation3], 0  ;;  %s914_s0 = inlined_call_operand.hbm [shape: f32[2,16,128], index: 0, kind: input, shape index: {}]   ;;  %s915_s1 = inlined_call_operand.hbm [shape: f32[2,16,128], index: 1, kind: output, shape index: {0}]   ;;  %s916_s2 = inlined_call_operand.hbm [shape: f32[2,16,128], index: 2, kind: output, shape index: {1}]  }
   0x1   :  { %10 = vsyncpa [#allocation3 + $0x1], 0 }
   0x2   :  { %11 = vsyncpa [#allocation4], 0 }
   0x3   :  { %13 = vsyncpa [#allocation4 + $0x1], 0 }
   0x4   :  { %14 = vsyncpa [#allocation7], 0 }
   0x5   :  { %16 = vsyncpa [#allocation7 + $0x1], 0  ;;  %s672_s9 = smov 0   ;;  %s674_s10 = smov 0  }
   0x6   :  { %s676_s11 = smov 0   ;;  %s678_s12 = smov 0  }
   0x7   :  { %s680_s13 = smov 0   ;;  %s682_s14 = smov 0  }
   0x8 LB: > { %s411_s15 = sadd.s32 4294967295, %s648_s14   ;;  %s412_s16 = sadd.s32 4294967294, %s648_s14   ;;  %s648_s14 = sphi %s682_s14, %s22_s14   ;;  %s644_s13 = sphi %s680_s13, %s931_s13   ;;  %s640_s12 = sphi %s678_s12, %s930_s12   ;;  %s636_s11 = sphi %s676_s11, %s929_s11   ;;  %s632_s10 = sphi %s674_s10, %s928_s10   ;;  %s628_s9 = sphi %s672_s9, %s927_s9  }
   0x9   : > { %s34_s17 = sadd.s32 1, %s644_s13  ;;  %s43_s18 = sadd.s32 1, %s636_s11 }
   0xa   : > { %p36_p0 = scmp.ge.s32.totalorder %s34_s17, 2  ;;  %p50_p1 = scmp.ne.s32.totalorder %s636_s11, %s632_s10 }
   0xb   : > { %p51_p2 = scmp.eq.s32.totalorder %s648_s14, 0  ;;  %p56_p3 = scmp.ne.s32.totalorder %s632_s10, %s628_s9 }
   0xc   : > { %s933_s17 = smov (%p36_p0, %s34_s17), 0  ;;  %p57_p5 = scmp.eq.s32.totalorder %s411_s15, 0 }
   0xd   : > { %p713_p4 = por %p51_p2, %p50_p1  ;;  %s38_s20 = ssub.s32 %s644_s13, %s933_s17 }
   0xe   : > { %p82_p6 = scmp.eq.s32.totalorder %s411_s15, 1  ;;  %p41_p7 = scmp.eq.s32.totalorder %s38_s20, 0 }
   0xf   : > { %p719_p8 = por %p57_p5, %p56_p3  ;;  %p88_p10 = scmp.eq.s32.totalorder %s412_s16, 1 }
  0x10   : > { %p723_p9 = por %p82_p6, %p50_p1  ;;  %p450_p13 = scmp.lt.s32.totalorder %s648_s14, 2 }
  0x11   : > { %s728_s23 = scalar_select %p41_p7, %s636_s11, %s43_s18  }
  0x12   : > { %s920_s22 = scalar_select %p723_p9, 1, 0 }
  0x13   : > { %p730_p11 = por %p88_p10, %p56_p3  ;;  %s136_s25 = sand.u32 1, %s636_s11  }
  0x14   : > { %s415_s26 = sshll.u32 %s136_s25, 4  ;;  %s430_s27 = sshll.u32 %s644_s13, 8 }
  0x15   : > { %s921_s24 = scalar_select %p730_p11, 1, 0 }
  0x16   : > { %s741_s30 = scalar_lea.hbm %s914_s0, %s430_s27  ;;  %s140_s3 = scalar_lea.vmem [#allocation2], %s415_s26 }
  0x17   : > { %s148_s4 = sshll.u32 %s140_s3, 4  ;;  %p747_p0 = pnand %p450_p13, %p713_p4  ;;  %s743_s4 = int_to_ptr.vmem [resolvable:$true] %s148_s4 }
  0x18   : > { %s752_s6 = scalar_lea.sflag [#allocation3], %s136_s25  ;;  %s504_s7 = scalar_lea.hbm %s741_s30, 256 }
  0x19   : > { %p505_p2 = scmp.ne.s32.totalorder %s741_s30, %s504_s7  ;;  %p506_p3 = pneg %p747_p0 }
  0x1a   : > { %s509_s16 = scalar_lea.hbm %s914_s0, 512  ;;  %p510_p4 = scmp.lt.u32.totalorder %s741_s30, %s914_s0 }
  0x1b   : > { %p507_p5 = pnand %p506_p3, %p505_p2  ;;  %p511_p7 = scmp.lt.u32.totalorder %s509_s16, %s504_s7 }
  0x1c   : > { %p513_p13 = scmp.lt.u32.totalorder %s504_s7, %s741_s30 }
  0x1d   : > { %p508_p6 = pneg %p507_p5  ;;  %p512_p10 = por %p511_p7, %p510_p4 }
  0x1f   : > { %p514_p12 = por %p513_p13, %p512_p10 }
  0x21   : > { %p515_p1 = pnand %p514_p12, %p508_p6 }
  0x23   : > { %518 = shalt.err (!%p515_p1)
}
  0x24   : > { %s519_s20 = scalar_lea.vmem %s743_s4, 256  ;;  %s650_s25 = smov [#allocation2]  }
  0x25   : > { %p520_p2 = scmp.ne.s32.totalorder %s743_s4, %s519_s20  ;;  %s524_s26 = sshll.u32 %s650_s25, 4  ;;  %s525_s26 = int_to_ptr.vmem [resolvable:$false] %s524_s26 }
  0x26   : > { %s526_s27 = scalar_lea.vmem %s525_s26, 512  ;;  %p527_p9 = scmp.lt.s32.totalorder %s743_s4, %s525_s26 }
  0x27   : > { %p522_p5 = pnand %p520_p2, %p506_p3  ;;  %p528_p4 = scmp.lt.s32.totalorder %s526_s27, %s519_s20 }
  0x29   : > { %p523_p11 = pneg %p522_p5  ;;  %p529_p7 = por %p528_p4, %p527_p9 }
  0x2b   : > { %p530_p10 = pnand %p529_p7, %p523_p11 }
  0x2d   : > { %533 = shalt.err (!%p530_p10)
}
  0x2e   : > { %s651_s28 = smov 128   ;;  %s652_s29 = smov 8  }
  0x2f   : > { %442 = dma.hbm_to_vmem [thread:$0]  (!%p747_p0), %s741_s30, 256, %s743_s4, %s752_s6, %s651_s28, %s651_s28, %s652_s29  }
  0x30   : > { %p156_p12 = scmp.lt.s32.totalorder %s648_s14, 3  ;;  %p923_p1 = scmp.ge.s32.totalorder %s648_s14, 1 }
  0x32   : > { %p157_p3 = pnand %p923_p1, %p156_p12 }
  0x33   : > { %s784_s3 = sand.u32 (!%p157_p3), 1, %s632_s10  }
  0x34   : > { %160 = sbr.rel (%p157_p3) target bundleno = 117 (0x75), region = 24  ;;  %s787_s7 = sshll.u32 (!%p157_p3), %s784_s3, 4 }
  0x35   : > { %s163_s8 = scalar_lea.sflag (!%p157_p3), [#allocation3], %s784_s3  ;;  %s166_s15 = scalar_lea.vmem (!%p157_p3), [#allocation2], %s787_s7 }
  0x3b   : > { %615 = dma.done.wait (%p719_p8), %s163_s8, 256  }
  0x3c   : > { %617 = vsyncadd (%p719_p8), %s163_s8, 4294967040  ;;  %v194_v0 = vlaneseq  ;;  %v795_v5 = vld [vmem:[%s166_s15] sm:$0xff]  ;;  %v193_v6 = vld [vmem:[%s166_s15 + $0x8] sm:$0xff]  ;;  %s191_s21 = scalar_lea.vmem [#allocation6], %s787_s7  ;;  %s431_s4 = sshll.u32 %s640_s12, 8 }
  0x3d   : > { %v197_v7 = vrot.slane %v795_v5, 6  ;;  %v198_v8 = vrot.slane %v193_v6, 6  ;;  %v211_v10 = vrot.slane %v795_v5, 7  ;;  %v212_v11 = vrot.slane %v193_v6, 7  ;;  %s292_s30 = sshll.u32 %s191_s21, 4  ;;  %s819_s5 = scalar_lea.vmem [#allocation5], %s787_s7  ;;  %s816_s30 = int_to_ptr.vmem [resolvable:$true] %s292_s30 }
  0x3e   : > { %v195_v1 = vshrl.u32 %v194_v0, 7  ;;  %v221_v12 = vrot.slane %v795_v5, 1  ;;  %v222_v13 = vrot.slane %v193_v6, 1  ;;  %v236_v14 = vrot.slane %v795_v5, 2  ;;  %s275_s6 = sshll.u32 %s819_s5, 4  ;;  %s825_s19 = scalar_lea.hbm %s916_s2, %s431_s4  ;;  %s827_s6 = int_to_ptr.vmem [resolvable:$true] %s275_s6 }
  0x3f   : > { %v237_v16 = vrot.slane %v193_v6, 2  ;;  %s833_s25 = scalar_lea.hbm %s915_s1, %s431_s4  ;;  %s261_s26 = scalar_lea.sflag [#allocation7], %s784_s3 }
  0x40   : > { %v205_v2 = vsub.s32 0, %v195_v1  ;;  %v196_v3 = vadd.s32 8, %v195_v1  ;;  %vm199_vm0 = vcmp.lt.s32.totalorder %v195_v1, 2  ;;  %v230_v4 = vsub.s32 7, %v195_v1  ;;  %s534_s27 = scalar_lea.vmem %s816_s30, 256  ;;  %p924_p9 = scmp.ne.s32.totalorder %s920_s22, 0 }
  0x41   : > { %vm213_vm1 = vcmp.lt.s32.totalorder %v195_v1, 1  ;;  %vm223_vm2 = vcmp.lt.s32.totalorder %v195_v1, 7  ;;  %vm238_vm3 = vcmp.lt.s32.totalorder %v195_v1, 6  ;;  %v201_v15 = vsel %vm199_vm0, %v198_v8, %v197_v7  ;;  %p535_p8 = scmp.ne.s32.totalorder %s816_s30, %s534_s27  ;;  %s653_s28 = smov [#allocation6]  }
  0x42   : > { %vm227_vm4 = vcmp.ge.s32.totalorder %v196_v3, 15  ;;  %v206_v9 = vrot.slane %v795_v5, %v205_v2  ;;  %v200_v17 = vsel %vm199_vm0, %v197_v7, %v198_v8  ;;  %v231_v18 = vrot.slane %v193_v6, %v230_v4  ;;  %s538_s29 = sshll.u32 %s653_s28, 4  ;;  %s539_s29 = int_to_ptr.vmem [resolvable:$false] %s538_s29 }
  0x43   : > { %v215_v20 = vsel %vm213_vm1, %v212_v11, %v211_v10  ;;  %v210_v21 = vadd.f32 %v200_v17, %v193_v6  ;;  %vm242_vm5 = vcmp.ge.s32.totalorder %v196_v3, 14  ;;  %v214_v24 = vsel %vm213_vm1, %v211_v10, %v212_v11  ;;  %p536_p11 = pnand %p535_p8, %p924_p9  ;;  %s540_s7 = scalar_lea.vmem %s539_s29, 512 }
  0x44   : > { %v207_v19 = vsel %vm199_vm0, %v206_v9, %v201_v15  ;;  %v217_v23 = vsel %vm213_vm1, %v206_v9, %v215_v20  ;;  %v224_v25 = vsel %vm223_vm2, %v221_v12, %v222_v13  ;;  %v225_v27 = vsel %vm223_vm2, %v222_v13, %v221_v12  ;;  %p541_p6 = scmp.lt.s32.totalorder %s816_s30, %s539_s29  ;;  %p542_p13 = scmp.lt.s32.totalorder %s540_s7, %s534_s27 }
  0x45   : > { %v209_v22 = vadd.f32 %v207_v19, %v795_v5  ;;  %v220_v26 = vadd.f32 %v214_v24, %v210_v21  ;;  %v240_v28 = vsel %vm238_vm3, %v237_v16, %v236_v14  ;;  %v233_v30 = vsel %vm227_vm4, %v231_v18, %v225_v27  ;;  %p537_p0 = pneg %p536_p11 }
  0x46   : > { %v244_v31 = vsel %vm242_vm5, %v231_v18, %v240_v28  ;;  %v239_v32 = vsel %vm238_vm3, %v236_v14, %v237_v16  ;;  %p543_p2 = por %p542_p13, %p541_p6 }
  0x47   : > { %v219_v29 = vadd.f32 %v217_v23, %v209_v22  ;;  %v235_v33 = vadd.f32 %v233_v30, %v220_v26 }
  0x48   : > { %p544_p5 = pnand %p543_p2, %p537_p0 }
  0x49   : > { %v234_v34 = vadd.f32 %v224_v25, %v219_v29  ;;  %v246_v35 = vadd.f32 %v244_v31, %v235_v33 }
  0x4b   : > { %v245_v36 = vadd.f32 %v239_v32, %v234_v34  ;;  %v248_v37 = vmul.f32 0.2, %v246_v35 }
  0x4d   : > { %v247_v38 = vmul.f32 0.2, %v245_v36  ;;  %250 = vst [vmem:[%s191_s21 + $0x8] sm:$0xff] %v248_v37  ;;  %v252_v39 = vsub.f32 %v193_v6, %v248_v37 }
  0x4f   : > { %249 = vst [vmem:[%s191_s21] sm:$0xff] %v247_v38  ;;  %v251_v40 = vsub.f32 %v795_v5, %v247_v38  ;;  %254 = vst [vmem:[%s819_s5 + $0x8] sm:$0xff] %v252_v39 }
  0x50   : > { %547 = shalt.err (!%p544_p5)
}
  0x51   : > { %s548_s8 = scalar_lea.hbm %s825_s19, 256  ;;  %s552_s4 = scalar_lea.hbm %s916_s2, 512 }
  0x52   : > { %p549_p4 = scmp.ne.s32.totalorder %s825_s19, %s548_s8  ;;  %p553_p12 = scmp.lt.u32.totalorder %s825_s19, %s916_s2 }
  0x53   : > { %p554_p1 = scmp.lt.u32.totalorder %s552_s4, %s548_s8  ;;  %p556_p8 = scmp.lt.u32.totalorder %s548_s8, %s825_s19 }
  0x54   : > { %p550_p7 = pnand %p549_p4, %p924_p9 }
  0x55   : > { %p555_p3 = por %p554_p1, %p553_p12 }
  0x56   : > { %p551_p10 = pneg %p550_p7 }
  0x57   : > { %p557_p11 = por %p556_p8, %p555_p3 }
  0x59   : > { %p558_p0 = pnand %p557_p11, %p551_p10 }
  0x5b   : > { %561 = shalt.err (!%p558_p0)
}
  0x5c   : > { %s654_s12 = smov 128   ;;  %s655_s20 = smov 8   ;;  %253 = vst [vmem:[%s819_s5] sm:$0xff] %v251_v40 }
  0x5d   : > { %436 = dma.vmem_to_hbm [thread:$0]  (%p924_p9), %s816_s30, 256, %s825_s19, %s261_s26, %s654_s12, %s654_s12, %s655_s20  }
  0x5e   : > { %s256_s27 = scalar_lea.sflag [#allocation4], %s784_s3  ;;  %s562_s28 = scalar_lea.vmem %s827_s6, 256 }
  0x5f   : > { %p563_p6 = scmp.ne.s32.totalorder %s827_s6, %s562_s28  ;;  %s656_s29 = smov [#allocation5]  }
  0x60   : > { %s566_s7 = sshll.u32 %s656_s29, 4  ;;  %s567_s7 = int_to_ptr.vmem [resolvable:$false] %s566_s7 }
  0x61   : > { %p564_p13 = pnand %p563_p6, %p924_p9  ;;  %s568_s8 = scalar_lea.vmem %s567_s7, 512 }
  0x62   : > { %p569_p5 = scmp.lt.s32.totalorder %s827_s6, %s567_s7  ;;  %p570_p4 = scmp.lt.s32.totalorder %s568_s8, %s562_s28 }
  0x63   : > { %p565_p2 = pneg %p564_p13 }
  0x64   : > { %p571_p7 = por %p570_p4, %p569_p5 }
  0x66   : > { %p572_p10 = pnand %p571_p7, %p565_p2 }
  0x68   : > { %575 = shalt.err (!%p572_p10)
}
  0x69   : > { %s576_s30 = scalar_lea.hbm %s833_s25, 256  ;;  %s580_s26 = scalar_lea.hbm %s915_s1, 512 }
  0x6a   : > { %p577_p12 = scmp.ne.s32.totalorder %s833_s25, %s576_s30  ;;  %p581_p8 = scmp.lt.u32.totalorder %s833_s25, %s915_s1 }
  0x6b   : > { %p582_p11 = scmp.lt.u32.totalorder %s580_s26, %s576_s30  ;;  %p584_p6 = scmp.lt.u32.totalorder %s576_s30, %s833_s25 }
  0x6c   : > { %p578_p1 = pnand %p577_p12, %p924_p9 }
  0x6d   : > { %p583_p0 = por %p582_p11, %p581_p8 }
  0x6e   : > { %p579_p3 = pneg %p578_p1 }
  0x6f   : > { %p585_p13 = por %p584_p6, %p583_p0 }
  0x71   : > { %p586_p2 = pnand %p585_p13, %p579_p3 }
  0x73   : > { %589 = shalt.err (!%p586_p2)
}
  0x74   : > { %435 = dma.vmem_to_hbm [thread:$0]  (%p924_p9), %s827_s6, 256, %s833_s25, %s256_s27, %s654_s12, %s654_s12, %s655_s20  }
  0x75 PF: > { %s307_s4 = sand.u32 1, %s628_s9   ;;  %p925_p5 = scmp.ne.s32.totalorder %s921_s24, 0 }
  0x76   : > { %p926_p4 = scmp.ge.s32.totalorder %s648_s14, 2  ;;  %s308_s16 = scalar_lea.sflag [#allocation4], %s307_s4 }
  0x78   : > { %p444_p7 = pnand %p926_p4, %p925_p5 }
  0x7a   : > { %619 = dma.done.wait (!%p444_p7), %s308_s16, 256  }
  0x7b   : > { %621 = vsyncadd (!%p444_p7), %s308_s16, 4294967040  ;;  %s317_s22 = scalar_lea.sflag [#allocation7], %s307_s4 }
  0x7c   : > { %623 = dma.done.wait (!%p444_p7), %s317_s22, 256  }
  0x7d   : > { %625 = vsyncadd (!%p444_p7), %s317_s22, 4294967040  ;;  %s22_s14 = sadd.s32 1, %s648_s14   ;;  %s927_s9 = smov %s632_s10 }
  0x7e   : > { %p19_p10 = scmp.ge.s32.totalorder %s22_s14, 4   ;;  %s928_s10 = smov %s636_s11 }
  0x7f   : > { %s929_s11 = smov %s728_s23  ;;  %s930_s12 = smov %s644_s13 }
  0x80   : > { %s931_s13 = smov %s933_s17  ;;  %21 = sbr.rel (!%p19_p10) target bundleno = 8 (0x8), region = 86 }
  0x87   :  { %322 = vsyncpa [#allocation3], 1 }
  0x88   :  { %324 = vsyncpa [#allocation3 + $0x1], 1 }
  0x89   :  { %325 = vsyncpa [#allocation4], 1 }
  0x8a   :  { %327 = vsyncpa [#allocation4 + $0x1], 1 }
  0x8b   :  { %328 = vsyncpa [#allocation7], 1 }
  0x8c   :  { %330 = vsyncpa [#allocation7 + $0x1], 1 }

</bundles_post_ra>
